<compile_context>
chip_gen: v5e
topology: v5e:2x2
jax: 0.10.0
libtpu: 0.0.40
codegen_flags: <defaults>
</compile_context>

<pallas_src>
import functools

import jax
import jax.numpy as jnp
from jax.experimental import pallas as pl
from jax.experimental.pallas import tpu as pltpu


def _mlp_kernel(*refs, n_layers):
    # refs = (x_ref, wT_0, ..., wT_{L-1}, oT_ref)
    #   x_ref  : (tile_n, dim_in)   -- untransposed batch slab
    #   wT_i   : (out_i, in_i)      -- torch nn.Linear weight layout
    #   oT_ref : (dim_out, tile_n)  -- lane-dense (batch on lanes) output
    x_ref = refs[0]
    w_refs = refs[1:1 + n_layers]
    oT_ref = refs[1 + n_layers]

    x = x_ref[...].astype(jnp.float32)

    # First layer: contract wT's `in` dim with x's last dim -> (out0, tile_n).
    # This folds the x transpose into the matmul (batch lands on lanes).
    h = jax.lax.dot_general(
        w_refs[0][...], x,
        dimension_numbers=(((1,), (1,)), ((), ())),
        preferred_element_type=jnp.float32,
        precision=jax.lax.Precision.HIGHEST,
    )
    if n_layers > 1:
        h = jnp.maximum(h, 0.0)

    for i in range(1, n_layers):
        h = jnp.dot(
            w_refs[i][...], h,
            preferred_element_type=jnp.float32,
            precision=jax.lax.Precision.HIGHEST,
        )
        if i < n_layers - 1:            # ReLU after every layer except the last
            h = jnp.maximum(h, 0.0)

    oT_ref[...] = h.astype(oT_ref.dtype)


def _vmem_limit_bytes(tile_n, dim_in, dim_out, wT_shapes, n_neurons_max):
    """Conservative VMEM budget (lane/sublane padded, double-buffered I/O)."""
    def pad(v, m):
        return ((v + m - 1) // m) * m
    in_blk = pad(tile_n, 8) * pad(dim_in, 128) * 4          # x block (lane-padded)
    out_blk = pad(dim_out, 8) * pad(tile_n, 128) * 4        # lane-dense out block
    w_blk = sum(pad(o, 8) * pad(i, 128) * 4 for (o, i) in wT_shapes)
    act = 2 * pad(n_neurons_max, 8) * pad(tile_n, 128) * 4  # live intermediates
    est = 2 * in_blk + 2 * out_blk + 2 * w_blk + act
    # Raise above v5e's 16 MiB default, stay under every generation's physical VMEM.
    return int(min(max(est * 3 // 2 + (4 << 20), 32 << 20), 64 << 20))


def vanilla_mlp(x, weights, *, tile_n=8192):
    """x: (N, dim_in) f32; weights: list of (in, out) f32 arrays (== torch W.T).

    Computes in a batch-on-lanes layout inside the kernel; x is consumed
    untransposed and unpadded, output is transposed back exactly once.
    """
    x = jnp.asarray(x, jnp.float32)
    n, dim_in = x.shape
    dim_out = weights[-1].shape[1]
    n_layers = len(weights)

    # Lane-aligned batch tile, clamped to the (lane-rounded) batch size.
    n_lane = ((n + 127) // 128) * 128
    tile_n = max(128, min((tile_n // 128) * 128, n_lane))
    grid = (pl.cdiv(n, tile_n),)        # partial boundary block is fine (bias-free)

    # Weights transposed to (out, in) so each layer is hT = W @ hT (tiny copies).
    wTs = [jnp.asarray(w, jnp.float32).T for w in weights]

    kernel = functools.partial(_mlp_kernel, n_layers=n_layers)

    in_specs = [pl.BlockSpec((tile_n, dim_in), lambda i: (i, 0))]
    for wT in wTs:
        # Full-shape weight blocks, resident across all grid steps.
        in_specs.append(pl.BlockSpec(wT.shape, lambda i: (0, 0)))

    # Lane-dense output block: (dim_out, tile_n) -> unmasked vst.
    out_spec = pl.BlockSpec((dim_out, tile_n), lambda i: (0, i))

    flops = 2 * n * sum(w.shape[0] * w.shape[1] for w in weights)
    bytes_accessed = (x.size + sum(w.size for w in weights) + n * dim_out) * 4
    cost = pl.CostEstimate(
        flops=flops, transcendentals=0, bytes_accessed=bytes_accessed)

    vmem_limit = _vmem_limit_bytes(
        tile_n, dim_in, dim_out,
        [w.shape for w in wTs],
        max(w.shape[0] for w in wTs),
    )

    outT = pl.pallas_call(
        kernel,
        out_shape=jax.ShapeDtypeStruct((dim_out, n), jnp.float32),
        grid_spec=pltpu.PrefetchScalarGridSpec(
            num_scalar_prefetch=0,
            grid=grid,
            in_specs=in_specs,
            out_specs=out_spec,
        ),
        compiler_params=pltpu.CompilerParams(
            # "parallel" lets the batch axis shard across both TensorCores on v7x.
            dimension_semantics=("parallel",),
            vmem_limit_bytes=vmem_limit,
        ),
        cost_estimate=cost,
    )(x, *wTs)

    # Single wrapper transpose back to the torch (N, dim_out) layout.
    return outT.T


def make_weights(key, dim_in, dim_out, n_neurons, n_hidden_layers):
    """Deterministic init. Shapes mirror nn.Linear(in, out, bias=False),
    stored transposed as (in, out)."""
    dims = [dim_in] + [n_neurons] * n_hidden_layers + [dim_out]
    weights = []
    for i in range(len(dims) - 1):
        key, sub = jax.random.split(key)
        fan_in, fan_out = dims[i], dims[i + 1]
        bound = 1.0 / jnp.sqrt(fan_in)  # kaiming-uniform-ish, like nn.Linear default
        w = jax.random.uniform(sub, (fan_in, fan_out), jnp.float32, -bound, bound)
        weights.append(w)
    return weights


def reference_mlp(x, weights):
    h = x
    for i, w in enumerate(weights):
        h = jnp.dot(h, w, precision=jax.lax.Precision.HIGHEST)
        if i < len(weights) - 1:
            h = jnp.maximum(h, 0.0)
    return h


if __name__ == "__main__":
    # config mirroring VanillaMLP(dim_in, dim_out, {'n_neurons':..., 'n_hidden_layers':...})
    dim_in, dim_out = 8, 4
    config = {"n_neurons": 32, "n_hidden_layers": 2}
    batch = 128

    key = jax.random.PRNGKey(0)
    kx, kw = jax.random.split(key)
    x = jax.random.normal(kx, (batch, dim_in), jnp.float32)
    weights = make_weights(kw, dim_in, dim_out,
                           config["n_neurons"], config["n_hidden_layers"])

    out = vanilla_mlp(x, weights)
    out = jax.block_until_ready(out)
    ref = reference_mlp(x, weights)
    assert out.shape == (batch, dim_out)
    assert jnp.allclose(out, ref, atol=2e-5, rtol=2e-5)

    # Also exercise the partial (non-lane-multiple) batch path.
    x2 = jax.random.normal(kx, (100, dim_in), jnp.float32)
    out2 = jax.block_until_ready(vanilla_mlp(x2, weights))
    ref2 = reference_mlp(x2, weights)
    assert out2.shape == (100, dim_out)
    assert jnp.allclose(out2, ref2, atol=2e-5, rtol=2e-5)

    print("KERNEL_OK")
</pallas_src>

<mosaic_0001>
module attributes {stable_mosaic.version = 11 : i64} {
  func.func @_mlp_kernel(%arg0: i32, %arg1: memref<128x8xf32, #tpu.memory_space<vmem>>, %arg2: memref<32x8xf32, #tpu.memory_space<vmem>>, %arg3: memref<32x32xf32, #tpu.memory_space<vmem>>, %arg4: memref<4x32xf32, #tpu.memory_space<vmem>>, %arg5: memref<4x128xf32, #tpu.memory_space<vmem>>) attributes {dimension_semantics = [#tpu.dimension_semantics<parallel>], iteration_bounds = array<i64: 1>, scalar_prefetch = 0 : i64, scratch_operands = 0 : i64, tpu.core_type = #tpu.core_type<tc>, window_params = [{transform_indices = @transform_0, window_bounds = array<i64: 128, 8>}, {pipeline_mode = #tpu.pipeline_mode<synchronous>, transform_indices = @transform_1, window_bounds = array<i64: 32, 8>}, {pipeline_mode = #tpu.pipeline_mode<synchronous>, transform_indices = @transform_2, window_bounds = array<i64: 32, 32>}, {pipeline_mode = #tpu.pipeline_mode<synchronous>, transform_indices = @transform_3, window_bounds = array<i64: 4, 32>}, {transform_indices = @transform_4, window_bounds = array<i64: 4, 128>}]} {
    %c0 = arith.constant 0 : index
    %c0_0 = arith.constant 0 : index
    %0 = vector.load %arg1[%c0, %c0_0] : memref<128x8xf32, #tpu.memory_space<vmem>>, vector<128x8xf32>
    %c0_1 = arith.constant 0 : index
    %c0_2 = arith.constant 0 : index
    %1 = vector.load %arg2[%c0_1, %c0_2] : memref<32x8xf32, #tpu.memory_space<vmem>>, vector<32x8xf32>
    %cst = arith.constant dense<0.000000e+00> : vector<32x128xf32>
    %2 = tpu.matmul %1, %0, %cst {dimension_numbers = #tpu.dot_dimension_numbers<[1], [1], [0], [0], [0, 0, 1, 0], [], []>, precision = #tpu.contract_precision<fp32>} : vector<32x8xf32>, vector<128x8xf32>, vector<32x128xf32> -> vector<32x128xf32>
    %cst_3 = arith.constant 0.000000e+00 : f32
    %3 = vector.broadcast %cst_3 : f32 to vector<32x128xf32>
    %4 = arith.maximumf %2, %3 : vector<32x128xf32>
    %c0_4 = arith.constant 0 : index
    %c0_5 = arith.constant 0 : index
    %5 = vector.load %arg3[%c0_4, %c0_5] : memref<32x32xf32, #tpu.memory_space<vmem>>, vector<32x32xf32>
    %cst_6 = arith.constant dense<0.000000e+00> : vector<32x128xf32>
    %6 = tpu.matmul %5, %4, %cst_6 {dimension_numbers = #tpu.dot_dimension_numbers<[1], [0], [0], [1], [0, 0, 1, 1], [], []>, precision = #tpu.contract_precision<fp32>} : vector<32x32xf32>, vector<32x128xf32>, vector<32x128xf32> -> vector<32x128xf32>
    %cst_7 = arith.constant 0.000000e+00 : f32
    %7 = vector.broadcast %cst_7 : f32 to vector<32x128xf32>
    %8 = arith.maximumf %6, %7 : vector<32x128xf32>
    %c0_8 = arith.constant 0 : index
    %c0_9 = arith.constant 0 : index
    %9 = vector.load %arg4[%c0_8, %c0_9] : memref<4x32xf32, #tpu.memory_space<vmem>>, vector<4x32xf32>
    %cst_10 = arith.constant dense<0.000000e+00> : vector<4x128xf32>
    %10 = tpu.matmul %9, %8, %cst_10 {dimension_numbers = #tpu.dot_dimension_numbers<[1], [0], [0], [1], [0, 0, 1, 1], [], []>, precision = #tpu.contract_precision<fp32>} : vector<4x32xf32>, vector<32x128xf32>, vector<4x128xf32> -> vector<4x128xf32>
    %c0_11 = arith.constant 0 : index
    %c0_12 = arith.constant 0 : index
    %11 = vector.load %arg5[%c0_11, %c0_12] : memref<4x128xf32, #tpu.memory_space<vmem>>, vector<4x128xf32>
    tpu.vector_store %arg5[%c0_11, %c0_12], %10 {strides = array<i32>} : memref<4x128xf32, #tpu.memory_space<vmem>>, vector<4x128xf32>,
    return
  }
  func.func @transform_0(%arg0: i32) -> (i32, i32) {
    %c0_i32 = arith.constant 0 : i32
    %c0_i32_0 = arith.constant 0 : i32
    return %arg0, %c0_i32 : i32, i32
  }
  func.func @transform_1(%arg0: i32) -> (i32, i32) {
    %c0_i32 = arith.constant 0 : i32
    %c0_i32_0 = arith.constant 0 : i32
    %c0_i32_1 = arith.constant 0 : i32
    return %c0_i32, %c0_i32_0 : i32, i32
  }
  func.func @transform_2(%arg0: i32) -> (i32, i32) {
    %c0_i32 = arith.constant 0 : i32
    %c0_i32_0 = arith.constant 0 : i32
    %c0_i32_1 = arith.constant 0 : i32
    return %c0_i32, %c0_i32_0 : i32, i32
  }
  func.func @transform_3(%arg0: i32) -> (i32, i32) {
    %c0_i32 = arith.constant 0 : i32
    %c0_i32_0 = arith.constant 0 : i32
    %c0_i32_1 = arith.constant 0 : i32
    return %c0_i32, %c0_i32_0 : i32, i32
  }
  func.func @transform_4(%arg0: i32) -> (i32, i32) {
    %c0_i32 = arith.constant 0 : i32
    %c0_i32_0 = arith.constant 0 : i32
    return %c0_i32, %arg0 : i32, i32
  }
}

</mosaic_0001>

<bundles_post_ra>
// kernel: tpu_custom_call.1
= control target key start
LH: loop header
LB: loop body
LE: loop exit
PB: predicated region body
PF: predicated region fallthrough
CT: control target
= control target key end

     0   :  { %vm38_vm0 = vcmask 64512   ;;  %s1498_s0 = inlined_call_operand.vmem [shape: f32[128,8], index: 0, kind: input, shape index: {}]   ;;  %s1499_s1 = inlined_call_operand.vmem [shape: f32[32,8], index: 1, kind: input, shape index: {}]   ;;  %s1500_s2 = inlined_call_operand.vmem [shape: f32[32,32], index: 2, kind: input, shape index: {}]   ;;  %s1501_s3 = inlined_call_operand.vmem [shape: f32[4,32], index: 3, kind: input, shape index: {}]   ;;  %s1502_s4 = inlined_call_operand.hbm [shape: f32[4,128], index: 4, kind: output, shape index: {}]  }
   0x1   :  { %v33_v0 = vld [vmem:[%s1498_s0 + $0x78] sm:$0xff]  ;;  %v32_v1 = vld [vmem:[%s1498_s0 + $0x70] sm:$0xff]  ;;  %v31_v2 = vld [vmem:[%s1498_s0 + $0x68] sm:$0xff] }
   0x2   :  { %v97_v3 = vsel %vm38_vm0, %v33_v0, 0  ;;  %v94_v4 = vsel %vm38_vm0, %v32_v1, 0  ;;  %v91_v5 = vsel %vm38_vm0, %v31_v2, 0  ;;  %v30_v6 = vld [vmem:[%s1498_s0 + $0x60] sm:$0xff]  ;;  %v29_v7 = vld [vmem:[%s1498_s0 + $0x58] sm:$0xff]  ;;  %v28_v17 = vld [vmem:[%s1498_s0 + $0x50] sm:$0xff] }
   0x3   :  { %v1113_v8 = vand.u32 4294901760, %v97_v3  ;;  %v1115_v9 = vand.u32 4294901760, %v94_v4  ;;  %v1117_v10 = vand.u32 4294901760, %v91_v5  ;;  %v88_v11 = vsel %vm38_vm0, %v30_v6, 0 }
   0x4   :  { %v1120_v12 = vand.u32 4294901760, %v88_v11  ;;  %v85_v15 = vsel %vm38_vm0, %v29_v7, 0 }
   0x5   :  { %100 = vmatpush.xpose.msra.mxu0 %v1113_v8  ;;  %v1124_v13 = vsub.f32 %v97_v3, %v1113_v8  ;;  %v1127_v14 = vsub.f32 %v94_v4, %v1115_v9  ;;  %v1131_v16 = vsub.f32 %v91_v5, %v1117_v10  ;;  %347 = vmatpush.xpose.msra.mxu3 %v1113_v8 }
   0x6   :  { %9 = vsyncpa [#allocation3], 0  ;;  %v1140_v20 = vand.u32 4294901760, %v85_v15  ;;  %v82_v21 = vsel %vm38_vm0, %v28_v17, 0  ;;  %v1152_v25 = vsub.f32 %v88_v11, %v1120_v12  ;;  %v27_v26 = vld [vmem:[%s1498_s0 + $0x48] sm:$0xff]  ;;  %v26_v34 = vld [vmem:[%s1498_s0 + $0x40] sm:$0xff] }
   0x7   :  { %v166_v18 = vand.u32 4294901760, %v1124_v13  ;;  %v172_v19 = vand.u32 4294901760, %v1127_v14  ;;  %279 = vmatpush.xpose.msra.mxu2 %v1124_v13  ;;  %v178_v24 = vand.u32 4294901760, %v1131_v16  ;;  %v1159_v28 = vand.u32 4294901760, %v82_v21  ;;  %v25_v41 = vld [vmem:[%s1498_s0 + $0x38] sm:$0xff]  ;;  %v24_v48 = vld [vmem:[%s1498_s0 + $0x30] sm:$0xff] }
   0x8   :  { %v79_v29 = vsel %vm38_vm0, %v27_v26, 0  ;;  %v184_v32 = vand.u32 4294901760, %v1152_v25  ;;  %v1168_v33 = vsub.f32 %v85_v15, %v1140_v20  ;;  %v76_v40 = vsel %vm38_vm0, %v26_v34, 0  ;;  %v23_v55 = vld [vmem:[%s1498_s0 + $0x28] sm:$0xff]  ;;  %v22_v62 = vld [vmem:[%s1498_s0 + $0x20] sm:$0xff]  ;;  %v21_v5 = vld [vmem:[%s1498_s0 + $0x18] sm:$0xff] }
   0x9   :  { %102 = vmatpush.xpose.msra.mxu0 %v1115_v9  ;;  %v167_v22 = vsub.f32 %v1124_v13, %v166_v18  ;;  %v173_v23 = vsub.f32 %v1127_v14, %v172_v19  ;;  %349 = vmatpush.xpose.msra.mxu3 %v1115_v9  ;;  %v179_v31 = vsub.f32 %v1131_v16, %v178_v24  ;;  %v1175_v35 = vand.u32 4294901760, %v79_v29  ;;  %v19_v34 = vld [vmem:[%s1498_s0 + $0x8] sm:$0xff]  ;;  %s1033_s13 = sshll.u32 %s1502_s4, 4  ;;  %s1034_s13 = int_to_ptr.hbm [resolvable:$true] %s1033_s13 }
   0xa   :  { %v1178_v36 = vsub.f32 %v82_v21, %v1159_v28  ;;  %v185_v38 = vsub.f32 %v1152_v25, %v184_v32  ;;  %v190_v39 = vand.u32 4294901760, %v1168_v33  ;;  %v1191_v42 = vand.u32 4294901760, %v76_v40 }
   0xb   :  { %v168_v27 = vand.u32 4294901760, %v167_v22  ;;  %282 = vmatpush.xpose.msra.mxu2 %v1127_v14  ;;  %v174_v30 = vand.u32 4294901760, %v173_v23  ;;  %v180_v37 = vand.u32 4294901760, %v179_v31  ;;  %v73_v46 = vsel %vm38_vm0, %v25_v41, 0  ;;  %v20_v22 = vld [vmem:[%s1498_s0 + $0x10] sm:$0xff]  ;;  %v37_v14 = vld [vmem:[%s1499_s1 + $0x18] sm:$0xff] }
   0xc   :  { %v196_v43 = vand.u32 4294901760, %v1178_v36  ;;  %v186_v44 = vand.u32 4294901760, %v185_v38  ;;  %v191_v45 = vsub.f32 %v1168_v33, %v190_v39  ;;  %v1200_v47 = vsub.f32 %v79_v29, %v1175_v35 }
   0xd   :  { %104 = vmatpush.xpose.msra.mxu0 %v1117_v10  ;;  %169 = vmatpush.xpose.msra.mxu1 %v168_v27  ;;  %v1210_v50 = vand.u32 4294901760, %v73_v46  ;;  %v70_v53 = vsel %vm38_vm0, %v24_v48, 0  ;;  %v1216_v54 = vsub.f32 %v76_v40, %v1191_v42  ;;  %v67_v57 = vsel %vm38_vm0, %v23_v55, 0 }
   0xe   :  { %351 = vmatpush.xpose.msra.mxu3 %v1117_v10  ;;  %v197_v49 = vsub.f32 %v1178_v36, %v196_v43  ;;  %v192_v51 = vand.u32 4294901760, %v191_v45  ;;  %v202_v52 = vand.u32 4294901760, %v1200_v47  ;;  %v1223_v56 = vand.u32 4294901760, %v70_v53 }
   0xf   :  { %285 = vmatpush.xpose.msra.mxu2 %v1131_v16  ;;  %v208_v60 = vand.u32 4294901760, %v1216_v54  ;;  %v1232_v61 = vsub.f32 %v73_v46, %v1210_v50  ;;  %v1239_v63 = vand.u32 4294901760, %v67_v57  ;;  %v64_v0 = vsel %vm38_vm0, %v22_v62, 0  ;;  %v18_v46 = vld [vmem:[%s1498_s0] sm:$0xff] }
  0x10   :  { %v198_v58 = vand.u32 4294901760, %v197_v49  ;;  %v203_v59 = vsub.f32 %v1200_v47, %v202_v52  ;;  %v1248_v4 = vsub.f32 %v70_v53, %v1223_v56  ;;  %v1255_v6 = vand.u32 4294901760, %v64_v0 }
  0x11   :  { %106 = vmatpush.xpose.msra.mxu0 %v1120_v12  ;;  %175 = vmatpush.xpose.msra.mxu1 %v174_v30  ;;  %v209_v2 = vsub.f32 %v1216_v54, %v208_v60  ;;  %v214_v3 = vand.u32 4294901760, %v1232_v61  ;;  %v1258_v7 = vsub.f32 %v67_v57, %v1239_v63  ;;  %v61_v21 = vsel %vm38_vm0, %v21_v5, 0 }
  0x12   :  { %353 = vmatpush.xpose.msra.mxu3 %v1120_v12  ;;  %v204_v1 = vand.u32 4294901760, %v203_v59  ;;  %v220_v17 = vand.u32 4294901760, %v1248_v4  ;;  %v1271_v23 = vand.u32 4294901760, %v61_v21  ;;  %v1279_v30 = vsub.f32 %v64_v0, %v1255_v6 }
  0x13   :  { %288 = vmatpush.xpose.msra.mxu2 %v1152_v25  ;;  %v210_v11 = vand.u32 4294901760, %v209_v2  ;;  %v215_v15 = vsub.f32 %v1232_v61, %v214_v3  ;;  %v226_v29 = vand.u32 4294901760, %v1258_v7  ;;  %v58_v31 = vsel %vm38_vm0, %v20_v22, 0  ;;  %v34_v2 = vld [vmem:[%s1499_s1] sm:$0xff] }
  0x14   :  { %v221_v27 = vsub.f32 %v1248_v4, %v220_v17  ;;  %v1294_v41 = vand.u32 4294901760, %v58_v31  ;;  %v55_v45 = vsel %vm38_vm0, %v19_v34, 0  ;;  %v52_v57 = vsel %vm38_vm0, %v18_v46, 0  ;;  %v35_v46 = vld [vmem:[%s1499_s1 + $0x8] sm:$0xff] }
  0x15   :  { %108 = vmatpush.xpose.msra.mxu0 %v1140_v20  ;;  %181 = vmatpush.xpose.msra.mxu1 %v180_v37  ;;  %v216_v26 = vand.u32 4294901760, %v215_v15  ;;  %v1288_v37 = vsub.f32 %v61_v21, %v1271_v23  ;;  %v227_v40 = vsub.f32 %v1258_v7, %v226_v29  ;;  %v1308_v53 = vand.u32 4294901760, %v55_v45 }
  0x16   :  { %355 = vmatpush.xpose.msra.mxu3 %v1140_v20  ;;  %v222_v38 = vand.u32 4294901760, %v221_v27  ;;  %v1311_v55 = vsub.f32 %v58_v31, %v1294_v41  ;;  %v1320_v62 = vand.u32 4294901760, %v52_v57  ;;  %v40_v5 = vsel %vm38_vm0, %v34_v2, 0 }
  0x17   :  { %291 = vmatpush.xpose.msra.mxu2 %v1168_v33  ;;  %v238_v48 = vand.u32 4294901760, %v1288_v37  ;;  %v228_v49 = vand.u32 4294901760, %v227_v40  ;;  %v49_v16 = vsel %vm38_vm0, %v37_v14, 0  ;;  %vm541_vm1 = vcmask 261120  }
  0x18   :  { %v244_v0 = vand.u32 4294901760, %v1311_v55 }
  0x19   :  { %110 = vmatpush.xpose.msra.mxu0 %v1159_v28  ;;  %187 = vmatpush.xpose.msra.mxu1 %v186_v44  ;;  %v232_v44 = vand.u32 4294901760, %v1279_v30 }
  0x1a   :  { %357 = vmatpush.xpose.msra.mxu3 %v1159_v28  ;;  %v245_v21 = vsub.f32 %v1311_v55, %v244_v0 }
  0x1b   :  { %294 = vmatpush.xpose.msra.mxu2 %v1178_v36 }
  0x1c   :  { %v246_v34 = vand.u32 4294901760, %v245_v21 }
  0x1d   :  { %112 = vmatpush.xpose.msra.mxu0 %v1175_v35  ;;  %193 = vmatpush.xpose.msra.mxu1 %v192_v51  ;;  %v233_v51 = vsub.f32 %v1279_v30, %v232_v44 }
  0x1e   :  { %359 = vmatpush.xpose.msra.mxu3 %v1175_v35 }
  0x1f   :  { %297 = vmatpush.xpose.msra.mxu2 %v1200_v47  ;;  %v234_v59 = vand.u32 4294901760, %v233_v51 }
  0x21   :  { %114 = vmatpush.xpose.msra.mxu0 %v1191_v42  ;;  %199 = vmatpush.xpose.msra.mxu1 %v198_v58  ;;  %v239_v58 = vsub.f32 %v1288_v37, %v238_v48 }
  0x22   :  { %361 = vmatpush.xpose.msra.mxu3 %v1191_v42 }
  0x23   :  { %300 = vmatpush.xpose.msra.mxu2 %v1216_v54  ;;  %v240_v15 = vand.u32 4294901760, %v239_v58 }
  0x25   :  { %116 = vmatpush.xpose.msra.mxu0 %v1210_v50  ;;  %205 = vmatpush.xpose.msra.mxu1 %v204_v1  ;;  %v1324_v1 = vsub.f32 %v55_v45, %v1308_v53 }
  0x26   :  { %363 = vmatpush.xpose.msra.mxu3 %v1210_v50 }
  0x27   :  { %303 = vmatpush.xpose.msra.mxu2 %v1232_v61  ;;  %v250_v22 = vand.u32 4294901760, %v1324_v1 }
  0x29   :  { %118 = vmatpush.xpose.msra.mxu0 %v1223_v56  ;;  %211 = vmatpush.xpose.msra.mxu1 %v210_v11  ;;  %v1332_v11 = vand.u32 4294901760, %v40_v5 }
  0x2a   :  { %365 = vmatpush.xpose.msra.mxu3 %v1223_v56 }
  0x2b   :  { %306 = vmatpush.xpose.msra.mxu2 %v1248_v4  ;;  %v132_v27 = vsub.f32 %v40_v5, %v1332_v11 }
  0x2d   :  { %120 = vmatpush.xpose.msra.mxu0 %v1239_v63  ;;  %217 = vmatpush.xpose.msra.mxu1 %v216_v26  ;;  %v1340_v26 = vsub.f32 %v52_v57, %v1320_v62  ;;  %v133_v31 = vand.u32 4294901760, %v132_v27 }
  0x2e   :  { %367 = vmatpush.xpose.msra.mxu3 %v1239_v63 }
  0x2f   :  { %309 = vmatpush.xpose.msra.mxu2 %v1258_v7  ;;  %v256_v40 = vand.u32 4294901760, %v1340_v26  ;;  %v134_v45 = vsub.f32 %v132_v27, %v133_v31 }
  0x31   :  { %122 = vmatpush.xpose.msra.mxu0 %v1255_v6  ;;  %223 = vmatpush.xpose.msra.mxu1 %v222_v38  ;;  %v251_v38 = vsub.f32 %v1324_v1, %v250_v22  ;;  %v135_v57 = vand.u32 4294901760, %v134_v45 }
  0x32   :  { %369 = vmatpush.xpose.msra.mxu3 %v1255_v6 }
  0x33   :  { %312 = vmatpush.xpose.msra.mxu2 %v1279_v30  ;;  %v252_v58 = vand.u32 4294901760, %v251_v38 }
  0x35   :  { %124 = vmatpush.xpose.msra.mxu0 %v1271_v23  ;;  %229 = vmatpush.xpose.msra.mxu1 %v228_v49  ;;  %v43_v49 = vsel %vm38_vm0, %v35_v46, 0 }
  0x36   :  { %371 = vmatpush.xpose.msra.mxu3 %v1271_v23  ;;  %v1356_v51 = vand.u32 4294901760, %v43_v49 }
  0x37   :  { %315 = vmatpush.xpose.msra.mxu2 %v1288_v37 }
  0x38   :  { %v140_v2 = vsub.f32 %v43_v49, %v1356_v51 }
  0x39   :  { %126 = vmatpush.xpose.msra.mxu0 %v1294_v41  ;;  %235 = vmatpush.xpose.msra.mxu1 %v234_v59  ;;  %v257_v59 = vsub.f32 %v1340_v26, %v256_v40 }
  0x3a   :  { %373 = vmatpush.xpose.msra.mxu3 %v1294_v41  ;;  %v141_v5 = vand.u32 4294901760, %v140_v2 }
  0x3b   :  { %318 = vmatpush.xpose.msra.mxu2 %v1311_v55 }
  0x3c   :  { %v142_v21 = vsub.f32 %v140_v2, %v141_v5 }
  0x3d   :  { %128 = vmatpush.xpose.msra.mxu0 %v1308_v53  ;;  %241 = vmatpush.xpose.msra.mxu1 %v240_v15  ;;  %v258_v15 = vand.u32 4294901760, %v257_v59  ;;  %v538_v59 = vld [vmem:[%s1500_s2 + $0x8] sm:$0xff] }
  0x3e   :  { %375 = vmatpush.xpose.msra.mxu3 %v1308_v53  ;;  %v143_v38 = vand.u32 4294901760, %v142_v21 }
  0x3f   :  { %321 = vmatpush.xpose.msra.mxu2 %v1324_v1 }
  0x41   :  { %130 = vmatpush.xpose.msra.mxu0 %v1320_v62  ;;  %247 = vmatpush.xpose.msra.mxu1 %v246_v34  ;;  %v36_v34 = vld [vmem:[%s1499_s1 + $0x10] sm:$0xff] }
  0x42   :  { %377 = vmatpush.xpose.msra.mxu3 %v1320_v62  ;;  %v46_v13 = vsel %vm38_vm0, %v36_v34, 0 }
  0x43   :  { %324 = vmatpush.xpose.msra.mxu2 %v1340_v26 }
  0x44   :  { %136 = vmatmul.f32.vlgmr.msra.gmra.mxu0 %v135_v57 }
  0x45   :  { %406 = vmatpush.xpose.msrb.mxu0 %v166_v18  ;;  %253 = vmatpush.xpose.msra.mxu1 %v252_v58  ;;  %v147_v18 = vand.u32 4294901760, %v46_v13 }
  0x46   :  { %381 = vmatmul.f32.vlgmr.msra.gmra.mxu3 %v133_v31  ;;  %327 = vmatmul.f32.vlgmr.msra.gmra.mxu2 %v132_v27 }
  0x47   :  { %v148_v45 = vsub.f32 %v46_v13, %v147_v18 }
  0x49   :  { %410 = vmatpush.xpose.msrb.mxu0 %v172_v19  ;;  %259 = vmatpush.xpose.msra.mxu1 %v258_v15  ;;  %v149_v31 = vand.u32 4294901760, %v148_v45  ;;  %v155_v19 = vand.u32 4294901760, %v49_v16 }
  0x4b   :  { %v150_v46 = vsub.f32 %v148_v45, %v149_v31 }
  0x4c   :  { %261 = vmatmul.f32.vlgmr.msra.gmra.mxu1 %v1332_v11  ;;  %144 = vmatmul.f32.gmra.mxu0 %v143_v38 }
  0x4d   :  { %414 = vmatpush.xpose.msrb.mxu0 %v178_v24  ;;  %485 = vmatpush.xpose.msrb.mxu1 %v1113_v8  ;;  %v151_v8 = vand.u32 4294901760, %v150_v46  ;;  %v156_v24 = vsub.f32 %v49_v16, %v155_v19 }
  0x4e   :  { %387 = vmatmul.f32.gmra.mxu3 %v141_v5  ;;  %332 = vmatmul.f32.gmra.mxu2 %v140_v2 }
  0x4f   :  { %v157_v27 = vand.u32 4294901760, %v156_v24 }
  0x51   :  { %418 = vmatpush.xpose.msrb.mxu0 %v184_v32  ;;  %487 = vmatpush.xpose.msrb.mxu1 %v1115_v9  ;;  %v158_v25 = vsub.f32 %v156_v24, %v157_v27 }
  0x53   :  { %v159_v9 = vand.u32 4294901760, %v158_v25 }
  0x54   :  { %265 = vmatmul.f32.gmra.mxu1 %v1356_v51  ;;  %152 = vmatmul.f32.gmra.mxu0 %v151_v8 }
  0x55   :  { %422 = vmatpush.xpose.msrb.mxu0 %v190_v39  ;;  %489 = vmatpush.xpose.msrb.mxu1 %v1117_v10 }
  0x56   :  { %393 = vmatmul.f32.gmra.mxu3 %v149_v31  ;;  %337 = vmatmul.f32.gmra.mxu2 %v148_v45 }
  0x59   :  { %426 = vmatpush.xpose.msrb.mxu0 %v196_v43  ;;  %491 = vmatpush.xpose.msrb.mxu1 %v1120_v12 }
  0x5c   :  { %269 = vmatmul.f32.gmra.mxu1 %v147_v18  ;;  %160 = vmatmul.f32.gmra.mxu0 %v159_v9 }
  0x5d   :  { %430 = vmatpush.xpose.msrb.mxu0 %v202_v52  ;;  %493 = vmatpush.xpose.msrb.mxu1 %v1140_v20 }
  0x5e   :  { %399 = vmatmul.f32.gmra.mxu3 %v157_v27  ;;  %342 = vmatmul.f32.gmra.mxu2 %v156_v24  ;;  %v539_v24 = vld [vmem:[%s1500_s2 + $0x10] sm:$0xff] }
  0x61   :  { %434 = vmatpush.xpose.msrb.mxu0 %v208_v60  ;;  %495 = vmatpush.xpose.msrb.mxu1 %v1159_v28 }
  0x64   :  { %273 = vmatmul.f32.gmra.mxu1 %v155_v19 }
  0x65   :  { %438 = vmatpush.xpose.msrb.mxu0 %v214_v3  ;;  %497 = vmatpush.xpose.msrb.mxu1 %v1175_v35 }
  0x69   :  { %442 = vmatpush.xpose.msrb.mxu0 %v220_v17  ;;  %499 = vmatpush.xpose.msrb.mxu1 %v1191_v42 }
  0x6d   :  { %446 = vmatpush.xpose.msrb.mxu0 %v226_v29  ;;  %501 = vmatpush.xpose.msrb.mxu1 %v1210_v50  ;;  %v537_v29 = vld [vmem:[%s1500_s2] sm:$0xff] }
  0x71   :  { %450 = vmatpush.xpose.msrb.mxu0 %v232_v44  ;;  %503 = vmatpush.xpose.msrb.mxu1 %v1223_v56 }
  0x75   :  { %454 = vmatpush.xpose.msrb.mxu0 %v238_v48  ;;  %505 = vmatpush.xpose.msrb.mxu1 %v1239_v63 }
  0x79   :  { %458 = vmatpush.xpose.msrb.mxu0 %v244_v0  ;;  %507 = vmatpush.xpose.msrb.mxu1 %v1255_v6 }
  0x7d   :  { %462 = vmatpush.xpose.msrb.mxu0 %v250_v22  ;;  %509 = vmatpush.xpose.msrb.mxu1 %v1271_v23 }
  0x81   :  { %466 = vmatpush.xpose.msrb.mxu0 %v256_v40  ;;  %511 = vmatpush.xpose.msrb.mxu1 %v1294_v41 }
  0x84   :  { %468 = vmatmul.f32.vlgmr.msrb.gmra.mxu0 %v1332_v11 }
  0x85   :  { %513 = vmatpush.xpose.msrb.mxu1 %v1308_v53 }
  0x89   :  { %515 = vmatpush.xpose.msrb.mxu1 %v1320_v62  ;;  %v543_v62 = vsel %vm541_vm1, %v537_v29, 0 }
  0x8a   :  { %v1431_v49 = vand.u32 4294901760, %v543_v62 }
  0x8c   :  { %472 = vmatmul.f32.gmra.mxu0 %v1356_v51  ;;  %517 = vmatmul.f32.vlgmr.msrb.gmra.mxu1 %v1332_v11  ;;  %v1437_v15 = vsub.f32 %v543_v62, %v1431_v49 }
  0x8e   :  { %v576_v46 = vand.u32 4294901760, %v1437_v15 }
  0x90   :  { %v577_v9 = vsub.f32 %v1437_v15, %v576_v46 }
  0x94   :  { %476 = vmatmul.f32.gmra.mxu0 %v147_v18  ;;  %521 = vmatmul.f32.gmra.mxu1 %v1356_v51 }
  0x9c   :  { %480 = vmatmul.f32.gmra.mxu0 %v155_v19  ;;  %525 = vmatmul.f32.gmra.mxu1 %v147_v18  ;;  %v546_v18 = vsel %vm541_vm1, %v538_v59, 0 }
  0x9d   :  { %v1445_v14 = vand.u32 4294901760, %v546_v18 }
  0xa4   :  { %529 = vmatmul.f32.gmra.mxu1 %v155_v19 }
  0xc1   :  { %v137_v10 = vpop.f32.mrf.mxu0 }
  0xc9   :  { %v262_v12 = vpop.f32.mrf.mxu1  ;;  %v145_v20 = vpop.f32.mrf.mxu0 }
  0xca   :  { %v328_v36 = vpop.f32.mrf.mxu2  ;;  %v382_v39 = vpop.f32.mrf.mxu3  ;;  %v263_v63 = vadd.f32 %v262_v12, %v137_v10  ;;  %v1458_v10 = vsub.f32 %v546_v18, %v1445_v14 }
  0xcc   :  { %v329_v23 = vadd.f32 %v328_v36, %v263_v63  ;;  %v578_v36 = vand.u32 4294901760, %v577_v9 }
  0xce   :  { %v383_v48 = vadd.f32 %v382_v39, %v329_v23  ;;  %v584_v39 = vand.u32 4294901760, %v1458_v10 }
  0xd1   :  { %v266_v28 = vpop.f32.mrf.mxu1  ;;  %v153_v32 = vpop.f32.mrf.mxu0 }
  0xd2   :  { %v333_v47 = vpop.f32.mrf.mxu2  ;;  %v388_v50 = vpop.f32.mrf.mxu3  ;;  %v267_v60 = vadd.f32 %v266_v28, %v145_v20 }
  0xd4   :  { %v334_v6 = vadd.f32 %v333_v47, %v267_v60  ;;  %v585_v60 = vsub.f32 %v1458_v10, %v584_v39 }
  0xd6   :  { %v389_v30 = vadd.f32 %v388_v50, %v334_v6 }
  0xd9   :  { %v270_v33 = vpop.f32.mrf.mxu1  ;;  %v161_v35 = vpop.f32.mrf.mxu0 }
  0xda   :  { %v338_v56 = vpop.f32.mrf.mxu2  ;;  %v271_v61 = vadd.f32 %v270_v33, %v153_v32  ;;  %v394_v3 = vpop.f32.mrf.mxu3  ;;  %v549_v32 = vsel %vm541_vm1, %v539_v24, 0 }
  0xdc   :  { %v339_v7 = vadd.f32 %v338_v56, %v271_v61 }
  0xde   :  { %v395_v37 = vadd.f32 %v394_v3, %v339_v7  ;;  %v586_v7 = vand.u32 4294901760, %v585_v60 }
  0xe1   :  { %v274_v42 = vpop.f32.mrf.mxu1 }
  0xe2   :  { %v275_v41 = vadd.f32 %v274_v42, %v161_v35  ;;  %v343_v44 = vpop.f32.mrf.mxu2  ;;  %v400_v40 = vpop.f32.mrf.mxu3  ;;  %v590_v42 = vand.u32 4294901760, %v549_v32 }
  0xe4   :  { %v344_v1 = vadd.f32 %v343_v44, %v275_v41  ;;  %v591_v61 = vsub.f32 %v549_v32, %v590_v42 }
  0xe6   :  { %v401_v2 = vadd.f32 %v400_v40, %v344_v1 }
 0x101   :  { %v469_v43 = vpop.f32.mrf.mxu0 }
 0x102   :  { %v470_v11 = vadd.f32 %v469_v43, %v383_v48 }
 0x109   :  { %v473_v52 = vpop.f32.mrf.mxu0  ;;  %v518_v54 = vpop.f32.mrf.mxu1 }
 0x10a   :  { %v474_v53 = vadd.f32 %v473_v52, %v389_v30  ;;  %v519_v51 = vadd.f32 %v518_v54, %v470_v11  ;;  %v540_v52 = vld [vmem:[%s1500_s2 + $0x18] sm:$0xff] }
 0x10c   :  { %v533_v21 = vmax.f32 %v519_v51, 0.0 }
 0x10e   :  { %v1447_v16 = vand.u32 4294901760, %v533_v21 }
 0x110   :  { %v638_v12 = vsub.f32 %v533_v21, %v1447_v16 }
 0x111   :  { %v522_v4 = vpop.f32.mrf.mxu1  ;;  %v477_v17 = vpop.f32.mrf.mxu0 }
 0x112   :  { %v478_v55 = vadd.f32 %v477_v17, %v395_v37  ;;  %v523_v22 = vadd.f32 %v522_v4, %v474_v53  ;;  %v639_v50 = vand.u32 4294901760, %v638_v12  ;;  %v552_v4 = vsel %vm541_vm1, %v540_v52, 0 }
 0x113   :  { %v592_v17 = vand.u32 4294901760, %v591_v61  ;;  %v598_v23 = vand.u32 4294901760, %v552_v4 }
 0x114   :  { %v534_v5 = vmax.f32 %v523_v22, 0.0  ;;  %v640_v3 = vsub.f32 %v638_v12, %v639_v50 }
 0x115   :  { %v593_v30 = vsub.f32 %v591_v61, %v592_v17  ;;  %v599_v37 = vsub.f32 %v552_v4, %v598_v23 }
 0x116   :  { %v1442_v45 = vand.u32 4294901760, %v534_v5  ;;  %v641_v29 = vand.u32 4294901760, %v640_v3 }
 0x117   :  { %v594_v41 = vand.u32 4294901760, %v593_v30  ;;  %v600_v44 = vand.u32 4294901760, %v599_v37 }
 0x118   :  { %v632_v27 = vsub.f32 %v534_v5, %v1442_v45 }
 0x119   :  { %v526_v0 = vpop.f32.mrf.mxu1  ;;  %v481_v58 = vpop.f32.mrf.mxu0  ;;  %v601_v48 = vsub.f32 %v599_v37, %v600_v44 }
 0x11a   :  { %v527_v26 = vadd.f32 %v526_v0, %v478_v55  ;;  %v482_v34 = vadd.f32 %v481_v58, %v401_v2  ;;  %v633_v35 = vand.u32 4294901760, %v632_v27 }
 0x11b   :  { %v602_v53 = vand.u32 4294901760, %v601_v48 }
 0x11c   :  { %v535_v57 = vmax.f32 %v527_v26, 0.0  ;;  %v634_v56 = vsub.f32 %v632_v27, %v633_v35 }
 0x11e   :  { %v1439_v13 = vand.u32 4294901760, %v535_v57  ;;  %v635_v6 = vand.u32 4294901760, %v634_v56 }
 0x120   :  { %v626_v19 = vsub.f32 %v535_v57, %v1439_v13 }
 0x121   :  { %v530_v38 = vpop.f32.mrf.mxu1 }
 0x122   :  { %v531_v31 = vadd.f32 %v530_v38, %v482_v34  ;;  %v627_v28 = vand.u32 4294901760, %v626_v19 }
 0x124   :  { %v536_v8 = vmax.f32 %v531_v31, 0.0  ;;  %v628_v47 = vsub.f32 %v626_v19, %v627_v28 }
 0x126   :  { %v566_v25 = vand.u32 4294901760, %v536_v8  ;;  %v629_v63 = vand.u32 4294901760, %v628_v47 }
 0x128   :  { %v620_v20 = vsub.f32 %v536_v8, %v566_v25  ;;  %567 = vmatpush.msrb.mxu2 %v566_v25  ;;  %808 = vmatpush.msra.mxu1 %v566_v25 }
 0x12a   :  { %569 = vmatpush.msrb.mxu2 %v1439_v13  ;;  %810 = vmatpush.msra.mxu1 %v1439_v13  ;;  %v621_v33 = vand.u32 4294901760, %v620_v20 }
 0x12c   :  { %571 = vmatpush.msrb.mxu2 %v1442_v45  ;;  %765 = vmatpush.msra.mxu0 %v621_v33  ;;  %v622_v43 = vsub.f32 %v620_v20, %v621_v33 }
 0x12d   :  { %812 = vmatpush.msra.mxu1 %v1442_v45 }
 0x12e   :  { %573 = vmatpush.msrb.mxu2 %v1447_v16  ;;  %769 = vmatpush.msra.mxu0 %v627_v28  ;;  %v623_v54 = vand.u32 4294901760, %v622_v43 }
 0x12f   :  { %814 = vmatpush.msra.mxu1 %v1447_v16  ;;  %579 = vmatmul.f32.vlgmr.msrb.gmra.mxu2 %v578_v36 }
 0x130   :  { %674 = vmatpush.msra.mxu2 %v620_v20  ;;  %624 = vmatpush.msrb.mxu3 %v623_v54 }
 0x131   :  { %773 = vmatpush.msra.mxu0 %v633_v35  ;;  %816 = vmatmul.f32.vlgmr.msra.gmra.mxu1 %v1431_v49 }
 0x132   :  { %677 = vmatpush.msra.mxu2 %v626_v19  ;;  %630 = vmatpush.msrb.mxu3 %v629_v63 }
 0x133   :  { %777 = vmatpush.msra.mxu0 %v639_v50 }
 0x134   :  { %680 = vmatpush.msra.mxu2 %v632_v27  ;;  %636 = vmatpush.msrb.mxu3 %v635_v6 }
 0x135   :  { %779 = vmatmul.f32.vlgmr.msra.gmra.mxu0 %v1431_v49 }
 0x136   :  { %683 = vmatpush.msra.mxu2 %v638_v12  ;;  %642 = vmatpush.msrb.mxu3 %v641_v29 }
 0x137   :  { %587 = vmatmul.f32.gmra.mxu2 %v586_v7  ;;  %644 = vmatmul.f32.vlgmr.msrb.gmra.mxu3 %v1431_v49 }
 0x138   :  { %718 = vmatpush.msra.mxu3 %v566_v25  ;;  %v836_v25 = vld [vmem:[%s1501_s3] sm:$0xf]  ;;  %s1069_s3 = smov [#allocation2]  }
 0x139   :  { %820 = vmatmul.f32.gmra.mxu1 %v1445_v14  ;;  %v838_v20 = vsel %vm541_vm1, %v836_v25, 0  ;;  %s1031_s10 = sshll.u32 %s1069_s3, 4  ;;  %s1032_s10 = int_to_ptr.vmem [resolvable:$true] %s1031_s10 }
 0x13a   :  { %720 = vmatpush.msra.mxu3 %v1439_v13 }
 0x13c   :  { %722 = vmatpush.msra.mxu3 %v1442_v45 }
 0x13d   :  { %783 = vmatmul.f32.gmra.mxu0 %v1445_v14 }
 0x13e   :  { %724 = vmatpush.msra.mxu3 %v1447_v16 }
 0x13f   :  { %595 = vmatmul.f32.gmra.mxu2 %v594_v41  ;;  %648 = vmatmul.f32.gmra.mxu3 %v1445_v14 }
 0x141   :  { %824 = vmatmul.f32.gmra.mxu1 %v590_v42 }
 0x145   :  { %787 = vmatmul.f32.gmra.mxu0 %v590_v42 }
 0x147   :  { %603 = vmatmul.f32.gmra.mxu2 %v602_v53  ;;  %652 = vmatmul.f32.gmra.mxu3 %v590_v42  ;;  %v860_v42 = vand.u32 4294901760, %v838_v20 }
 0x149   :  { %828 = vmatmul.f32.gmra.mxu1 %v598_v23  ;;  %v861_v63 = vsub.f32 %v838_v20, %v860_v42 }
 0x14d   :  { %791 = vmatmul.f32.gmra.mxu0 %v598_v23 }
 0x14f   :  { %656 = vmatmul.f32.gmra.mxu3 %v598_v23  ;;  %686 = vmatmul.f32.vlgmr.msra.gmra.mxu2 %v1437_v15  ;;  %v862_v23 = vand.u32 4294901760, %v861_v63 }
 0x151   :  { %v863_v48 = vsub.f32 %v861_v63, %v862_v23 }
 0x157   :  { %691 = vmatmul.f32.gmra.mxu2 %v1458_v10  ;;  %728 = vmatmul.f32.vlgmr.msra.gmra.mxu3 %v576_v46 }
 0x15f   :  { %696 = vmatmul.f32.gmra.mxu2 %v591_v61  ;;  %734 = vmatmul.f32.gmra.mxu3 %v584_v39 }
 0x167   :  { %701 = vmatmul.f32.gmra.mxu2 %v599_v37  ;;  %740 = vmatmul.f32.gmra.mxu3 %v592_v17 }
 0x16f   :  { %746 = vmatmul.f32.gmra.mxu3 %v600_v44 }
 0x1ae   :  { %v817_v57 = vpop.f32.mrf.mxu1 }
 0x1b2   :  { %v580_v55 = vpop.f32.mrf.mxu2  ;;  %v780_v51 = vpop.f32.mrf.mxu0 }
 0x1b6   :  { %v821_v5 = vpop.f32.mrf.mxu1 }
 0x1ba   :  { %v588_v62 = vpop.f32.mrf.mxu2  ;;  %v645_v0 = vpop.f32.mrf.mxu3 }
 0x1bb   :  { %v784_v2 = vpop.f32.mrf.mxu0  ;;  %v646_v13 = vadd.f32 %v645_v0, %v580_v55 }
 0x1be   :  { %v825_v8 = vpop.f32.mrf.mxu1 }
 0x1c2   :  { %v596_v1 = vpop.f32.mrf.mxu2  ;;  %v649_v11 = vpop.f32.mrf.mxu3 }
 0x1c3   :  { %v650_v21 = vadd.f32 %v649_v11, %v588_v62  ;;  %v788_v46 = vpop.f32.mrf.mxu0 }
 0x1c6   :  { %v829_v54 = vpop.f32.mrf.mxu1 }
 0x1ca   :  { %v604_v22 = vpop.f32.mrf.mxu2  ;;  %v653_v26 = vpop.f32.mrf.mxu3 }
 0x1cb   :  { %v654_v38 = vadd.f32 %v653_v26, %v596_v1  ;;  %v792_v47 = vpop.f32.mrf.mxu0  ;;  %v864_v1 = vand.u32 4294901760, %v863_v48 }
 0x1d2   :  { %v657_v40 = vpop.f32.mrf.mxu3  ;;  %v687_v49 = vpop.f32.mrf.mxu2 }
 0x1d3   :  { %v688_v45 = vadd.f32 %v687_v49, %v646_v13  ;;  %v658_v28 = vadd.f32 %v657_v40, %v604_v22 }
 0x1da   :  { %v692_v58 = vpop.f32.mrf.mxu2  ;;  %v729_v59 = vpop.f32.mrf.mxu3 }
 0x1db   :  { %v693_v18 = vadd.f32 %v692_v58, %v650_v21  ;;  %v730_v14 = vadd.f32 %v729_v59, %v688_v45 }
 0x1dd   :  { %v781_v9 = vadd.f32 %v780_v51, %v730_v14 }
 0x1df   :  { %v818_v35 = vadd.f32 %v817_v57, %v781_v9 }
 0x1e1   :  { %v832_v56 = vmax.f32 %v818_v35, 0.0 }
 0x1e2   :  { %v735_v15 = vpop.f32.mrf.mxu3  ;;  %v697_v34 = vpop.f32.mrf.mxu2 }
 0x1e3   :  { %v736_v31 = vadd.f32 %v735_v15, %v693_v18  ;;  %v698_v16 = vadd.f32 %v697_v34, %v654_v38  ;;  %v858_v6 = vand.u32 4294901760, %v832_v56 }
 0x1e5   :  { %v785_v24 = vadd.f32 %v784_v2, %v736_v31  ;;  %v900_v37 = vsub.f32 %v832_v56, %v858_v6 }
 0x1e7   :  { %v822_v32 = vadd.f32 %v821_v5, %v785_v24  ;;  %v901_v11 = vand.u32 4294901760, %v900_v37 }
 0x1e9   :  { %v833_v50 = vmax.f32 %v822_v32, 0.0  ;;  %v902_v49 = vsub.f32 %v900_v37, %v901_v11 }
 0x1ea   :  { %v741_v19 = vpop.f32.mrf.mxu3  ;;  %v702_v12 = vpop.f32.mrf.mxu2 }
 0x1eb   :  { %v742_v27 = vadd.f32 %v741_v19, %v698_v16  ;;  %v703_v36 = vadd.f32 %v702_v12, %v658_v28  ;;  %v856_v3 = vand.u32 4294901760, %v833_v50  ;;  %v903_v57 = vand.u32 4294901760, %v902_v49 }
 0x1ed   :  { %v789_v10 = vadd.f32 %v788_v46, %v742_v27  ;;  %v894_v29 = vsub.f32 %v833_v50, %v856_v3 }
 0x1ef   :  { %v826_v33 = vadd.f32 %v825_v8, %v789_v10  ;;  %v895_v55 = vand.u32 4294901760, %v894_v29 }
 0x1f1   :  { %v834_v39 = vmax.f32 %v826_v33, 0.0  ;;  %v896_v26 = vsub.f32 %v894_v29, %v895_v55 }
 0x1f2   :  { %v747_v43 = vpop.f32.mrf.mxu3 }
 0x1f3   :  { %v748_v52 = vadd.f32 %v747_v43, %v703_v36  ;;  %v854_v60 = vand.u32 4294901760, %v834_v39  ;;  %v897_v51 = vand.u32 4294901760, %v896_v26 }
 0x1f5   :  { %v793_v61 = vadd.f32 %v792_v47, %v748_v52  ;;  %v888_v7 = vsub.f32 %v834_v39, %v854_v60 }
 0x1f7   :  { %v830_v4 = vadd.f32 %v829_v54, %v793_v61  ;;  %v889_v44 = vand.u32 4294901760, %v888_v7 }
 0x1f9   :  { %v835_v17 = vmax.f32 %v830_v4, 0.0  ;;  %v890_v0 = vsub.f32 %v888_v7, %v889_v44 }
 0x1fb   :  { %v852_v30 = vand.u32 4294901760, %v835_v17  ;;  %v891_v40 = vand.u32 4294901760, %v890_v0 }
 0x1fd   :  { %v882_v41 = vsub.f32 %v835_v17, %v852_v30  ;;  %853 = vmatpush.msrb.mxu2 %v852_v30 }
 0x1ff   :  { %v883_v53 = vand.u32 4294901760, %v882_v41  ;;  %855 = vmatpush.msrb.mxu2 %v854_v60 }
 0x201   :  { %v884_v62 = vsub.f32 %v882_v41, %v883_v53  ;;  %857 = vmatpush.msrb.mxu2 %v856_v3 }
 0x203   :  { %859 = vmatpush.msrb.mxu2 %v858_v6  ;;  %v885_v22 = vand.u32 4294901760, %v884_v62 }
 0x204   :  { %865 = vmatmul.f32.vlgmr.msrb.gmra.mxu2 %v864_v1 }
 0x205   :  { %924 = vmatpush.msra.mxu2 %v882_v41  ;;  %886 = vmatpush.msrb.mxu3 %v885_v22 }
 0x207   :  { %927 = vmatpush.msra.mxu2 %v888_v7  ;;  %892 = vmatpush.msrb.mxu3 %v891_v40 }
 0x209   :  { %930 = vmatpush.msra.mxu2 %v894_v29  ;;  %898 = vmatpush.msrb.mxu3 %v897_v51 }
 0x20b   :  { %933 = vmatpush.msra.mxu2 %v900_v37  ;;  %904 = vmatpush.msrb.mxu3 %v903_v57 }
 0x20c   :  { %906 = vmatmul.f32.vlgmr.msrb.gmra.mxu3 %v860_v42  ;;  %936 = vmatmul.f32.vlgmr.msra.gmra.mxu2 %v861_v63 }
 0x20d   :  { %982 = vmatpush.msrb.mxu2 %v883_v53  ;;  %953 = vmatpush.msra.mxu3 %v852_v30 }
 0x20f   :  { %986 = vmatpush.msrb.mxu2 %v889_v44  ;;  %955 = vmatpush.msra.mxu3 %v854_v60 }
 0x211   :  { %990 = vmatpush.msrb.mxu2 %v895_v55  ;;  %957 = vmatpush.msra.mxu3 %v856_v3 }
 0x213   :  { %994 = vmatpush.msrb.mxu2 %v901_v11  ;;  %959 = vmatpush.msra.mxu3 %v858_v6 }
 0x214   :  { %963 = vmatmul.f32.vlgmr.msra.gmra.mxu3 %v862_v23  ;;  %996 = vmatmul.f32.vlgmr.msrb.gmra.mxu2 %v860_v42 }
 0x215   :  { %1013 = vmatpush.msrb.mxu3 %v852_v30 }
 0x217   :  { %1015 = vmatpush.msrb.mxu3 %v854_v60 }
 0x219   :  { %1017 = vmatpush.msrb.mxu3 %v856_v3 }
 0x21b   :  { %1019 = vmatpush.msrb.mxu3 %v858_v6 }
 0x21c   :  { %1021 = vmatmul.f32.vlgmr.msrb.gmra.mxu3 %v860_v42 }
 0x287   :  { %v866_v58 = vpop.f32.mrf.mxu2 }
 0x28f   :  { %v907_v59 = vpop.f32.mrf.mxu3  ;;  %v937_v2 = vpop.f32.mrf.mxu2 }
 0x290   :  { %v908_v5 = vadd.f32 %v907_v59, %v866_v58 }
 0x292   :  { %v938_v21 = vadd.f32 %v937_v2, %v908_v5 }
 0x297   :  { %v964_v15 = vpop.f32.mrf.mxu3  ;;  %v997_v13 = vpop.f32.mrf.mxu2 }
 0x298   :  { %v965_v34 = vadd.f32 %v964_v15, %v938_v21 }
 0x29a   :  { %v998_v18 = vadd.f32 %v997_v13, %v965_v34 }
 0x29f   :  { %v1022_v38 = vpop.f32.mrf.mxu3 }
 0x2a0   :  { %v1023_v45 = vadd.f32 %v1022_v38, %v998_v18 }
 0x2a2   :  { %1025 = vst [vmem:[#allocation2] sm:$0xf] %v1023_v45 }
 0x2a3   :  { %1036 = dma.vmem_to_hbm [thread:$0]  %s1032_s10, 64, %s1034_s13, [#allocation3]  }
 0x2a4   :  { %1067 = dma.done.wait [#allocation3], 64  }
 0x2a5   :  { %1068 = vsyncadd [#allocation3], 4294967232 }
 0x2a6   :  { %1041 = vsyncpa [#allocation3], 1 }

</bundles_post_ra>
